<compile_context>
chip_gen: v7x
topology: tpu7x:2x2x1
jax: 0.10.0
libtpu: 0.0.40
codegen_flags: <defaults>
</compile_context>

<pallas_src>
import functools

import jax
import jax.numpy as jnp
from jax import lax
from jax.experimental import pallas as pl
from jax.experimental.pallas import tpu as pltpu


def _round_up(n: int, m: int) -> int:
    return ((n + m - 1) // m) * m


def _l2_normalize(a, scale=1.0, eps=1e-12):
    """F.normalize(a, dim=-1) * scale, in f32 (rsqrt, no divide). Hoisted to JAX."""
    a32 = a.astype(jnp.float32)
    inv = lax.rsqrt(jnp.maximum(jnp.sum(a32 * a32, axis=-1, keepdims=True),
                                jnp.float32(eps * eps)))
    return a32 * (inv * jnp.float32(scale))


def _dc_ce_kernel(*refs, k_tile, has_bias):
    """One (batch-tile, K-chunk) step of CE over cosine-similarity logits.

    refs (in order): x (TB,Dp), centroids chunk (TK,Dp), y (TB,1) int32,
    [bias (1,TK) f32 if has_bias], loss out (TB,1) f32,
    scratch: m (TB,1), l (TB,1), tgt (TB,1) f32.
    x / centroids are already L2-normalized and 1/temp is folded into the
    centroids, so the kernel is just matmul + online logsumexp + target gather.
    """
    if has_bias:
        x_ref, c_ref, y_ref, b_ref, loss_ref, m_ref, l_ref, t_ref = refs
    else:
        x_ref, c_ref, y_ref, loss_ref, m_ref, l_ref, t_ref = refs
        b_ref = None

    k = pl.program_id(1)
    nk = pl.num_programs(1)

    @pl.when(k == 0)
    def _init():
        m_ref[...] = jnp.full_like(m_ref, -jnp.inf)
        l_ref[...] = jnp.zeros_like(l_ref)
        t_ref[...] = jnp.zeros_like(t_ref)

    # (TB, TK) logits chunk on the MXU with f32 accumulation.
    s = lax.dot_general(
        x_ref[...], c_ref[...],
        dimension_numbers=(((1,), (1,)), ((), ())),
        preferred_element_type=jnp.float32)
    if has_bias:
        # Padded class columns -> -1e30 (bias is all-zero except the last chunk).
        s = s + b_ref[...]

    # Online (flash-style) logsumexp update.
    m_prev = m_ref[...]
    m_new = jnp.maximum(m_prev, jnp.max(s, axis=-1, keepdims=True))
    alpha = jnp.exp(m_prev - m_new)
    l_ref[...] = alpha * l_ref[...] + jnp.sum(jnp.exp(s - m_new), axis=-1,
                                              keepdims=True)
    m_ref[...] = m_new

    # Running target-logit gather (the single full-width iota/compare).
    tb, tk = s.shape
    cls = lax.broadcasted_iota(jnp.int32, (tb, tk), 1) + k * k_tile
    t_ref[...] = t_ref[...] + jnp.sum(
        jnp.where(cls == y_ref[...], s, 0.0), axis=-1, keepdims=True)

    @pl.when(k == nk - 1)
    def _finalize():
        # loss = logsumexp(logits) - logits[target]
        loss_ref[...] = m_ref[...] + jnp.log(l_ref[...]) - t_ref[...]


def _cosine_ce_row_losses(xn, cn, assignments, *, tile_b=256, tile_k=512):
    """Per-row CE of (xn @ cn.T) with integer targets.

    xn: (B, D) L2-normalized embeddings (compute dtype).
    cn: (K, D) L2-normalized centroids with 1/temp already folded in.
    Returns f32 (B,) per-row losses.
    """
    B, D = xn.shape
    K, Dc = cn.shape
    assert D == Dc
    f32 = jnp.float32

    Dp = _round_up(D, 128)
    itemsize = jnp.dtype(xn.dtype).itemsize

    # Lane-dense tiles, auto-shrunk so double-buffered blocks + the (TB,TK) f32
    # logits chunk stay well below v7x's 64 MiB VMEM.
    TB = max(8, (min(int(tile_b), _round_up(B, 8)) // 8) * 8)
    TK = max(128, (min(int(tile_k), _round_up(K, 128)) // 128) * 128)

    def _vmem_est(tb, tk):
        return (2 * tb * Dp * itemsize        # x tile (double-buffered)
                + 2 * tk * Dp * itemsize      # centroid chunk (double-buffered)
                + 4 * tb * tk * 4             # f32 logits chunk + epilogue temporaries
                + 8 * tb * 4 + 2 * tk * 4)    # y / out / scratch / bias

    budget = 40 << 20
    while _vmem_est(TB, TK) > budget and TK > 128:
        TK = max(128, ((TK // 2) // 128) * 128)
    while _vmem_est(TB, TK) > budget and TB > 8:
        TB = max(8, ((TB // 2) // 8) * 8)

    Bp = _round_up(B, TB)
    Kp = _round_up(K, TK)
    nb, nk = Bp // TB, Kp // TK
    has_bias = Kp != K

    # Pad only when needed (skip the extra HBM round-trip for aligned shapes).
    xp = xn if (Bp, Dp) == (B, D) else jnp.zeros((Bp, Dp), xn.dtype).at[:B, :D].set(xn)
    cp = cn if (Kp, Dp) == (K, D) else jnp.zeros((Kp, Dp), cn.dtype).at[:K, :D].set(cn)
    y2 = assignments.astype(jnp.int32).reshape(B, 1)
    yp = y2 if Bp == B else jnp.zeros((Bp, 1), jnp.int32).at[:B, :].set(y2)

    in_specs = [
        pl.BlockSpec((TB, Dp), lambda i, k: (i, 0)),   # x tile, resident across K chunks
        pl.BlockSpec((TK, Dp), lambda i, k: (k, 0)),   # centroid chunk, pipelined over k
        pl.BlockSpec((TB, 1), lambda i, k: (i, 0)),    # assignments tile
    ]
    args = [xp, cp, yp]
    if has_bias:
        bias = jnp.where(jnp.arange(Kp) < K, f32(0.0), f32(-1e30)).reshape(1, Kp)
        in_specs.append(pl.BlockSpec((1, TK), lambda i, k: (0, k)))
        args.append(bias)

    kernel = functools.partial(_dc_ce_kernel, k_tile=TK, has_bias=has_bias)

    cost = pl.CostEstimate(
        flops=int(2 * Bp * Kp * Dp + 8 * Bp * Kp),
        transcendentals=int(Bp * Kp + 3 * Bp * nk),
        bytes_accessed=int(xp.size * itemsize + nb * cp.size * itemsize
                           + 2 * Bp * 4 + (nb * Kp * 4 if has_bias else 0)),
    )

    vmem_limit = int(min(64 << 20, max(32 << 20, 2 * _vmem_est(TB, TK))))

    row_losses = pl.pallas_call(
        kernel,
        out_shape=jax.ShapeDtypeStruct((Bp, 1), f32),
        grid=(nb, nk),
        in_specs=in_specs,
        out_specs=pl.BlockSpec((TB, 1), lambda i, k: (i, 0)),
        scratch_shapes=[pltpu.VMEM((TB, 1), f32),   # running max  m
                        pltpu.VMEM((TB, 1), f32),   # running sum  l
                        pltpu.VMEM((TB, 1), f32)],  # target logit
        compiler_params=pltpu.CompilerParams(
            dimension_semantics=("parallel", "arbitrary"),  # batch parallel (2 TCs on v7x)
            vmem_limit_bytes=vmem_limit),
        cost_estimate=cost,
    )(*args)

    return row_losses[:B, 0]


def deepcluster_loss(x1, centroids, assignments, temp, *, tile_b=256, tile_k=512):
    """DeepCluster sub-loss: mean CE(cosine(x1, centroids)/temp, assignments)."""
    xn = _l2_normalize(x1).astype(x1.dtype)
    cn = _l2_normalize(centroids, scale=1.0 / float(temp)).astype(x1.dtype)
    rows = _cosine_ce_row_losses(xn, cn, assignments, tile_b=tile_b, tile_k=tile_k)
    return jnp.mean(rows)


def composite_loss(x1, x2, sub_loss_params, loss_weights, pos_mat=None, two_way=True):
    """CompositeLoss.forward: weighted sum of sub-losses.

    Each sub-loss is the DeepCluster-style Pallas kernel above; x2 / pos_mat /
    two_way are accepted for interface parity but unused by that sub-loss.
    """
    assert len(sub_loss_params) == len(loss_weights)
    # Hoisted once for all sub-losses: x1 is normalized a single time; each
    # sub-loss folds its 1/temp into its own normalized centroids.
    xn = _l2_normalize(x1).astype(x1.dtype)
    out = jnp.float32(0.0)
    for params, w in zip(sub_loss_params, loss_weights):
        # NOTE: assignments must lie in [0, K); out-of-range targets silently
        # gather 0 (no runtime check inside the kernel).
        cn = _l2_normalize(params["centroids"],
                           scale=1.0 / float(params["temp"])).astype(x1.dtype)
        rows = _cosine_ce_row_losses(xn, cn, params["assignments"])
        out = out + jnp.mean(rows) * w
    return out


# ----------------------------- references -----------------------------------

def _reference_deepcluster(x1, centroids, assignments, temp):
    eps = 1e-12
    x = x1.astype(jnp.float32)
    c = centroids.astype(jnp.float32)
    xn = x / jnp.maximum(jnp.linalg.norm(x, axis=-1, keepdims=True), eps)
    cn = c / jnp.maximum(jnp.linalg.norm(c, axis=-1, keepdims=True), eps)
    logits = (xn @ cn.T) / temp
    logp = jax.nn.log_softmax(logits, axis=-1)
    return -jnp.mean(logp[jnp.arange(x1.shape[0]), assignments])


def _reference_composite(x1, sub_loss_params, loss_weights):
    out = 0.0
    for p, w in zip(sub_loss_params, loss_weights):
        out = out + _reference_deepcluster(
            x1, p["centroids"], p["assignments"], p["temp"]) * w
    return out


if __name__ == "__main__":
    B, D = 8, 32
    key = jax.random.PRNGKey(0)
    kx, k2, kc1, kc2, ky1, ky2 = jax.random.split(key, 6)

    x1 = jax.random.normal(kx, (B, D), dtype=jnp.float32)
    x2 = jax.random.normal(k2, (B, D), dtype=jnp.float32)  # unused by the sub-loss

    K1, K2 = 16, 24
    sub_losses = [
        dict(centroids=jax.random.normal(kc1, (K1, D), dtype=jnp.float32),
             assignments=jax.random.randint(ky1, (B,), 0, K1, dtype=jnp.int32),
             temp=0.1),
        dict(centroids=jax.random.normal(kc2, (K2, D), dtype=jnp.float32),
             assignments=jax.random.randint(ky2, (B,), 0, K2, dtype=jnp.int32),
             temp=0.2),
    ]
    weights = [1.0, 0.5]

    # f32 path: tight check against the plain-JAX reference.
    out = jax.block_until_ready(composite_loss(x1, x2, sub_losses, weights))
    ref = _reference_composite(x1, sub_losses, weights)
    assert jnp.allclose(out, ref, rtol=1e-5, atol=1e-5), (out, ref)

    # bf16 fast path (halved DMA bytes, bf16 MXU with f32 accumulation); loose tol.
    x1_bf = x1.astype(jnp.bfloat16)
    sub_bf = [dict(centroids=p["centroids"].astype(jnp.bfloat16),
                   assignments=p["assignments"], temp=p["temp"]) for p in sub_losses]
    out_bf = jax.block_until_ready(composite_loss(x1_bf, x2, sub_bf, weights))
    assert jnp.allclose(out_bf.astype(jnp.float32), ref, atol=0.1), (out_bf, ref)

    print("KERNEL_OK")
</pallas_src>

<mosaic_0001>
module attributes {stable_mosaic.version = 11 : i64} {
  func.func @_dc_ce_kernel(%arg0: i32, %arg1: i32, %arg2: memref<8x128xf32, #tpu.memory_space<vmem>>, %arg3: memref<128x128xf32, #tpu.memory_space<vmem>>, %arg4: memref<8x1xi32, #tpu.memory_space<vmem>>, %arg5: memref<1x128xf32, #tpu.memory_space<vmem>>, %arg6: memref<8x1xf32, #tpu.memory_space<vmem>>, %arg7: memref<8x1xf32, #tpu.memory_space<vmem>>, %arg8: memref<8x1xf32, #tpu.memory_space<vmem>>, %arg9: memref<8x1xf32, #tpu.memory_space<vmem>>) attributes {dimension_semantics = [#tpu.dimension_semantics<parallel>, #tpu.dimension_semantics<arbitrary>], iteration_bounds = array<i64: 1, 1>, scalar_prefetch = 0 : i64, scratch_operands = 3 : i64, tpu.core_type = #tpu.core_type<tc>, window_params = [{transform_indices = @transform_0, window_bounds = array<i64: 8, 128>}, {transform_indices = @transform_1, window_bounds = array<i64: 128, 128>}, {transform_indices = @transform_2, window_bounds = array<i64: 8, 1>}, {transform_indices = @transform_3, window_bounds = array<i64: 1, 128>}, {transform_indices = @transform_4, window_bounds = array<i64: 8, 1>}]} {
    %c0_i32 = arith.constant 0 : i32
    %0 = arith.cmpi eq, %arg1, %c0_i32 : i32
    %1 = arith.extui %0 : i1 to i32
    %c0_i32_0 = arith.constant 0 : i32
    %2 = arith.cmpi ne, %1, %c0_i32_0 : i32
    scf.if %2 {
      %cst_26 = arith.constant 0xFF800000 : f32
      %42 = vector.broadcast %cst_26 : f32 to vector<8x1xf32>
      %c0_27 = arith.constant 0 : index
      %c0_28 = arith.constant 0 : index
      %43 = vector.load %arg7[%c0_27, %c0_28] : memref<8x1xf32, #tpu.memory_space<vmem>>, vector<8x1xf32>
      tpu.vector_store %arg7[%c0_27, %c0_28], %42 {strides = array<i32>} : memref<8x1xf32, #tpu.memory_space<vmem>>, vector<8x1xf32>,
      %cst_29 = arith.constant 0.000000e+00 : f32
      %44 = vector.broadcast %cst_29 : f32 to vector<8x1xf32>
      %c0_30 = arith.constant 0 : index
      %c0_31 = arith.constant 0 : index
      %45 = vector.load %arg8[%c0_30, %c0_31] : memref<8x1xf32, #tpu.memory_space<vmem>>, vector<8x1xf32>
      tpu.vector_store %arg8[%c0_30, %c0_31], %44 {strides = array<i32>} : memref<8x1xf32, #tpu.memory_space<vmem>>, vector<8x1xf32>,
      %cst_32 = arith.constant 0.000000e+00 : f32
      %46 = vector.broadcast %cst_32 : f32 to vector<8x1xf32>
      %c0_33 = arith.constant 0 : index
      %c0_34 = arith.constant 0 : index
      %47 = vector.load %arg9[%c0_33, %c0_34] : memref<8x1xf32, #tpu.memory_space<vmem>>, vector<8x1xf32>
      tpu.vector_store %arg9[%c0_33, %c0_34], %46 {strides = array<i32>} : memref<8x1xf32, #tpu.memory_space<vmem>>, vector<8x1xf32>,
    } else {
    }
    %c0 = arith.constant 0 : index
    %c0_1 = arith.constant 0 : index
    %3 = vector.load %arg2[%c0, %c0_1] : memref<8x128xf32, #tpu.memory_space<vmem>>, vector<8x128xf32>
    %c0_2 = arith.constant 0 : index
    %c0_3 = arith.constant 0 : index
    %4 = vector.load %arg3[%c0_2, %c0_3] : memref<128x128xf32, #tpu.memory_space<vmem>>, vector<128x128xf32>
    %cst = arith.constant dense<0.000000e+00> : vector<8x128xf32>
    %5 = tpu.matmul %3, %4, %cst {dimension_numbers = #tpu.dot_dimension_numbers<[1], [1], [0], [0], [0, 0, 1, 0], [], []>} : vector<8x128xf32>, vector<128x128xf32>, vector<8x128xf32> -> vector<8x128xf32>
    %c0_4 = arith.constant 0 : index
    %c0_5 = arith.constant 0 : index
    %6 = vector.load %arg5[%c0_4, %c0_5] : memref<1x128xf32, #tpu.memory_space<vmem>>, vector<1x128xf32>
    %7 = vector.broadcast %6 : vector<1x128xf32> to vector<8x128xf32>
    %8 = arith.addf %5, %7 : vector<8x128xf32>
    %c0_6 = arith.constant 0 : index
    %c0_7 = arith.constant 0 : index
    %9 = vector.load %arg7[%c0_6, %c0_7] : memref<8x1xf32, #tpu.memory_space<vmem>>, vector<8x1xf32>
    %cst_8 = arith.constant dense<0xFF800000> : vector<8xf32>
    %10 = vector.multi_reduction <maximumf>, %8, %cst_8 [1] : vector<8x128xf32> to vector<8xf32>
    %11 = vector.shape_cast %10 : vector<8xf32> to vector<8x1xf32>
    %12 = arith.maximumf %9, %11 : vector<8x1xf32>
    %13 = arith.subf %9, %12 : vector<8x1xf32>
    %14 = math.exp %13 : vector<8x1xf32>
    %c0_9 = arith.constant 0 : index
    %c0_10 = arith.constant 0 : index
    %15 = vector.load %arg8[%c0_9, %c0_10] : memref<8x1xf32, #tpu.memory_space<vmem>>, vector<8x1xf32>
    %16 = arith.mulf %14, %15 : vector<8x1xf32>
    %17 = vector.broadcast %12 : vector<8x1xf32> to vector<8x128xf32>
    %18 = arith.subf %8, %17 : vector<8x128xf32>
    %19 = math.exp %18 : vector<8x128xf32>
    %cst_11 = arith.constant dense<0.000000e+00> : vector<8xf32>
    %20 = vector.multi_reduction <add>, %19, %cst_11 [1] : vector<8x128xf32> to vector<8xf32>
    %21 = vector.shape_cast %20 : vector<8xf32> to vector<8x1xf32>
    %22 = arith.addf %16, %21 : vector<8x1xf32>
    %c0_12 = arith.constant 0 : index
    %c0_13 = arith.constant 0 : index
    %23 = vector.load %arg8[%c0_12, %c0_13] : memref<8x1xf32, #tpu.memory_space<vmem>>, vector<8x1xf32>
    tpu.vector_store %arg8[%c0_12, %c0_13], %22 {strides = array<i32>} : memref<8x1xf32, #tpu.memory_space<vmem>>, vector<8x1xf32>,
    %c0_14 = arith.constant 0 : index
    %c0_15 = arith.constant 0 : index
    %24 = vector.load %arg7[%c0_14, %c0_15] : memref<8x1xf32, #tpu.memory_space<vmem>>, vector<8x1xf32>
    tpu.vector_store %arg7[%c0_14, %c0_15], %12 {strides = array<i32>} : memref<8x1xf32, #tpu.memory_space<vmem>>, vector<8x1xf32>,
    %25 = tpu.iota {dimensions = array<i32: 1>} : vector<8x128xi32>
    %c128_i32 = arith.constant 128 : i32
    %26 = arith.muli %arg1, %c128_i32 : i32
    %27 = vector.broadcast %26 : i32 to vector<8x128xi32>
    %28 = arith.addi %25, %27 : vector<8x128xi32>
    %c0_16 = arith.constant 0 : index
    %c0_17 = arith.constant 0 : index
    %29 = vector.load %arg9[%c0_16, %c0_17] : memref<8x1xf32, #tpu.memory_space<vmem>>, vector<8x1xf32>
    %c0_18 = arith.constant 0 : index
    %c0_19 = arith.constant 0 : index
    %30 = vector.load %arg4[%c0_18, %c0_19] : memref<8x1xi32, #tpu.memory_space<vmem>>, vector<8x1xi32>
    %31 = vector.broadcast %30 : vector<8x1xi32> to vector<8x128xi32>
    %32 = arith.cmpi eq, %28, %31 : vector<8x128xi32>
    %cst_20 = arith.constant 0.000000e+00 : f32
    %33 = vector.broadcast %cst_20 : f32 to vector<8x128xf32>
    %34 = arith.select %32, %8, %33 : vector<8x128xi1>, vector<8x128xf32>
    %cst_21 = arith.constant dense<0.000000e+00> : vector<8xf32>
    %35 = vector.multi_reduction <add>, %34, %cst_21 [1] : vector<8x128xf32> to vector<8xf32>
    %36 = vector.shape_cast %35 : vector<8xf32> to vector<8x1xf32>
    %37 = arith.addf %29, %36 : vector<8x1xf32>
    %c0_22 = arith.constant 0 : index
    %c0_23 = arith.constant 0 : index
    %38 = vector.load %arg9[%c0_22, %c0_23] : memref<8x1xf32, #tpu.memory_space<vmem>>, vector<8x1xf32>
    tpu.vector_store %arg9[%c0_22, %c0_23], %37 {strides = array<i32>} : memref<8x1xf32, #tpu.memory_space<vmem>>, vector<8x1xf32>,
    %c0_i32_24 = arith.constant 0 : i32
    %39 = arith.cmpi eq, %arg1, %c0_i32_24 : i32
    %40 = arith.extui %39 : i1 to i32
    %c0_i32_25 = arith.constant 0 : i32
    %41 = arith.cmpi ne, %40, %c0_i32_25 : i32
    scf.if %41 {
      %c0_26 = arith.constant 0 : index
      %c0_27 = arith.constant 0 : index
      %42 = vector.load %arg7[%c0_26, %c0_27] : memref<8x1xf32, #tpu.memory_space<vmem>>, vector<8x1xf32>
      %c0_28 = arith.constant 0 : index
      %c0_29 = arith.constant 0 : index
      %43 = vector.load %arg8[%c0_28, %c0_29] : memref<8x1xf32, #tpu.memory_space<vmem>>, vector<8x1xf32>
      %44 = math.log %43 : vector<8x1xf32>
      %45 = arith.addf %42, %44 : vector<8x1xf32>
      %c0_30 = arith.constant 0 : index
      %c0_31 = arith.constant 0 : index
      %46 = vector.load %arg9[%c0_30, %c0_31] : memref<8x1xf32, #tpu.memory_space<vmem>>, vector<8x1xf32>
      %47 = arith.subf %45, %46 : vector<8x1xf32>
      %c0_32 = arith.constant 0 : index
      %c0_33 = arith.constant 0 : index
      %48 = vector.load %arg6[%c0_32, %c0_33] : memref<8x1xf32, #tpu.memory_space<vmem>>, vector<8x1xf32>
      tpu.vector_store %arg6[%c0_32, %c0_33], %47 {strides = array<i32>} : memref<8x1xf32, #tpu.memory_space<vmem>>, vector<8x1xf32>,
    } else {
    }
    return
  }
  func.func @transform_0(%arg0: i32, %arg1: i32) -> (i32, i32) {
    %c0_i32 = arith.constant 0 : i32
    %c0_i32_0 = arith.constant 0 : i32
    return %arg0, %c0_i32 : i32, i32
  }
  func.func @transform_1(%arg0: i32, %arg1: i32) -> (i32, i32) {
    %c0_i32 = arith.constant 0 : i32
    %c0_i32_0 = arith.constant 0 : i32
    return %arg1, %c0_i32 : i32, i32
  }
  func.func @transform_2(%arg0: i32, %arg1: i32) -> (i32, i32) {
    %c0_i32 = arith.constant 0 : i32
    %c0_i32_0 = arith.constant 0 : i32
    return %arg0, %c0_i32 : i32, i32
  }
  func.func @transform_3(%arg0: i32, %arg1: i32) -> (i32, i32) {
    %c0_i32 = arith.constant 0 : i32
    %c0_i32_0 = arith.constant 0 : i32
    return %c0_i32, %arg1 : i32, i32
  }
  func.func @transform_4(%arg0: i32, %arg1: i32) -> (i32, i32) {
    %c0_i32 = arith.constant 0 : i32
    %c0_i32_0 = arith.constant 0 : i32
    return %arg0, %c0_i32 : i32, i32
  }
}

</mosaic_0001>

<bundles_post_ra>
// kernel: tpu_custom_call.1
= control target key start
LH: loop header
LB: loop body
LE: loop exit
PB: predicated region body
PF: predicated region fallthrough
CT: control target
= control target key end

     0   :  { %9 = vsyncpa [#allocation6], 0  ;;  %s305_s15 = smov [#allocation5]   ;;  %s369_s0 = inlined_call_operand.vmem [shape: f32[8,128], index: 0, kind: input, shape index: {}]   ;;  %s370_s1 = inlined_call_operand.hbm [shape: f32[128,128], index: 1, kind: input, shape index: {}]   ;;  %s371_s2 = inlined_call_operand.vmem [shape: s32[8,1], index: 2, kind: input, shape index: {}]   ;;  %s372_s3 = inlined_call_operand.vmem [shape: f32[1,128], index: 3, kind: input, shape index: {}]   ;;  %s373_s4 = inlined_call_operand.vmem [shape: f32[8,1], index: 4, kind: output, shape index: {}]  }
   0x1   :  { %s17_s16 = sshll.u32 %s305_s15, 4  ;;  %s281_s19 = scalar_lea.hbm %s370_s1, 2048  ;;  %s18_s16 = int_to_ptr.vmem [resolvable:$true] %s17_s16 }
   0x2   :  { %p282_p0 = scmp.ne.s32.totalorder %s370_s1, %s281_s19  ;;  %p285_p1 = scmp.lt.u32.totalorder %s281_s19, %s370_s1 }
   0x4   :  { %p287_p2 = pnand %p285_p1, %p282_p0 }
   0x6   :  { %290 = shalt.err (!%p287_p2)
}
   0x7   :  { %s291_s24 = scalar_lea.vmem %s18_s16, 2048  ;;  %p296_p4 = scmp.lt.s32.totalorder %s18_s16, %s18_s16 }
   0x8   :  { %p292_p3 = scmp.ne.s32.totalorder %s18_s16, %s291_s24  ;;  %p297_p5 = scmp.lt.s32.totalorder %s291_s24, %s291_s24 }
   0xa   :  { %p298_p6 = por %p297_p5, %p296_p4 }
   0xc   :  { %p299_p7 = pnand %p298_p6, %p292_p3 }
   0xe   :  { %302 = shalt.err (!%p299_p7)
}
   0xf   :  { %s306_s25 = smov 128   ;;  %s307_s26 = smov 8  }
  0x10   :  { %23 = dma.hbm_to_vmem [thread:$0]  %s370_s1, 2048, %s18_s16, [#allocation6], %s306_s25, %s306_s25, %s307_s26  }
  0x11   :  { %303 = dma.done.wait [#allocation6], 2048  }
  0x12   :  { %304 = vsyncadd [#allocation6], 4294965248  ;;  %vm35_vm0 = vcmask 7168   ;;  %v308_v0 = vmov 0.0|0.0   ;;  %v309_v1 = vmov 0.0   ;;  %vm310_vm1 = vmmov 0  }
  0x13   :  { %241 = vmatprep.subr.bf16.mxu0 %v308_v0  ;;  %37 = vst.msk [vmem:[#allocation3] sm:$0xff] %vm35_vm0, %v309_v1  ;;  %38 = vst.msk [vmem:[#allocation4] sm:$0xff] %vm35_vm0, %v309_v1  ;;  %238 = vmatprep.mubr.msk.f32.mxu0 %vm310_vm1, %v309_v1  ;;  %v311_v2 = vmov 0   ;;  %v40_v3 = vld [vmem:[#allocation5] sm:$0xff]  ;;  %v41_v4 = vld [vmem:[#allocation5 + $0x8] sm:$0xff]  ;;  %v312_v29 = vmov -inf   ;;  %v156_v41 = vlaneseq }
  0x14   :  { %274 = vset.pattern.permute.xlu1 %v311_v2  ;;  %273 = vset.pattern.permute.xlu0 %v311_v2  ;;  %v242_v5 = vpack.c.bf16 %v41_v4, %v40_v3  ;;  %v42_v6 = vld [vmem:[#allocation5 + $0x10] sm:$0xff]  ;;  %v43_v7 = vld [vmem:[#allocation5 + $0x18] sm:$0xff]  ;;  %v162_v8 = vld [vmem:[%s371_s2] sm:$0xff]  ;;  %36 = vst.msk [vmem:[#allocation2] sm:$0xff] %vm35_vm0, %v312_v29 }
  0x15   :  { %164 = vperm.xlu1 %274, %v162_v8   ;;  %v245_v9 = vpack.c.bf16 %v43_v7, %v42_v6  ;;  %v44_v10 = vld [vmem:[#allocation5 + $0x20] sm:$0xff]  ;;  %v45_v11 = vld [vmem:[#allocation5 + $0x28] sm:$0xff]  ;;  %v46_v13 = vld [vmem:[#allocation5 + $0x30] sm:$0xff]  ;;  %v157_v42 = vand.u32 127, %v156_v41 }
  0x16   :  { %243 = vmatpush3.bf16.xpose.msra.mxu0 %v242_v5  ;;  %v248_v12 = vpack.c.bf16 %v45_v11, %v44_v10  ;;  %v47_v14 = vld [vmem:[#allocation5 + $0x38] sm:$0xff]  ;;  %v48_v16 = vld [vmem:[#allocation5 + $0x40] sm:$0xff]  ;;  %v49_v17 = vld [vmem:[#allocation5 + $0x48] sm:$0xff] }
  0x17   :  { %244 = vmatprep.subr.bf16.mxu0 %v308_v0  ;;  %v251_v15 = vpack.c.bf16 %v47_v14, %v46_v13  ;;  %v254_v18 = vpack.c.bf16 %v49_v17, %v48_v16  ;;  %v50_v19 = vld [vmem:[#allocation5 + $0x50] sm:$0xff]  ;;  %v51_v20 = vld [vmem:[#allocation5 + $0x58] sm:$0xff]  ;;  %v52_v22 = vld [vmem:[#allocation5 + $0x60] sm:$0xff] }
  0x18   :  { %v257_v21 = vpack.c.bf16 %v51_v20, %v50_v19  ;;  %v53_v23 = vld [vmem:[#allocation5 + $0x68] sm:$0xff]  ;;  %v54_v25 = vld [vmem:[#allocation5 + $0x70] sm:$0xff]  ;;  %v55_v26 = vld [vmem:[#allocation5 + $0x78] sm:$0xff] }
  0x19   :  { %v260_v24 = vpack.c.bf16 %v53_v23, %v52_v22  ;;  %v263_v27 = vpack.c.bf16 %v55_v26, %v54_v25  ;;  %v39_v28 = vld [vmem:[%s369_s0] sm:$0xff] }
  0x1a   :  { %v188_v30 = vld [vmem:[%s372_s3] ss:$0 sm:$0xff]  ;;  %v140_v48 = vld [vmem:[#allocation3] sm:$0xff]  ;;  %v161_v52 = vld [vmem:[#allocation4] sm:$0xff] }
  0x1b   :  { %v133_v34 = vld [vmem:[#allocation2] sm:$0xff] }
  0x1e   :  { %246 = vmatpush3.bf16.xpose.msra.mxu0 %v245_v9 }
  0x1f   :  { %247 = vmatprep.subr.bf16.mxu0 %v308_v0 }
  0x26   :  { %249 = vmatpush3.bf16.xpose.msra.mxu0 %v248_v12 }
  0x27   :  { %250 = vmatprep.subr.bf16.mxu0 %v308_v0 }
  0x2e   :  { %252 = vmatpush3.bf16.xpose.msra.mxu0 %v251_v15 }
  0x2f   :  { %253 = vmatprep.subr.bf16.mxu0 %v308_v0 }
  0x36   :  { %255 = vmatpush3.bf16.xpose.msra.mxu0 %v254_v18 }
  0x37   :  { %256 = vmatprep.subr.bf16.mxu0 %v308_v0 }
  0x3e   :  { %258 = vmatpush3.bf16.xpose.msra.mxu0 %v257_v21 }
  0x3f   :  { %259 = vmatprep.subr.bf16.mxu0 %v308_v0 }
  0x46   :  { %261 = vmatpush3.bf16.xpose.msra.mxu0 %v260_v24 }
  0x47   :  { %262 = vmatprep.subr.bf16.mxu0 %v308_v0 }
  0x4e   :  { %264 = vmatpush3.bf16.xpose.msra.mxu0 %v263_v27 }
  0x55   :  { %239 = vmatmul.mubr.f32.vlgmr.msra.gmra.mrb[0].mxu0 %v39_v28 }
  0x94   :  { %v165_v43 = vpop.permute.xlu1 %164 }
  0x95   :  { %vm166_vm2 = vcmp.eq.s32.totalorder %v157_v42, %v165_v43 }
 0x128   :  { %v129_v31 = vpop.f32.mrb[0].mxu0 }
 0x129   :  { %v130_v32 = vadd.f32 %v188_v30, %v129_v31  ;;  %v240_v33 = vpop.f32.mrb[1].mxu0 }
 0x12b   :  { %134 = vmax.xlane.f32.xlu0 %v130_v32  ;;  %v167_v45 = vsel %vm166_vm2, %v130_v32, 0.0 }
 0x1b8   :  { %v135_v35 = vpop.xlane.xlu0 %134 }
 0x1b9   :  { %v136_v36 = vmax.f32 %v133_v34, %v135_v35 }
 0x1bb   :  { %v137_v37 = vsub.f32 %v133_v34, %v136_v36  ;;  %155 = vst.msk [vmem:[#allocation2] sm:$0xff] %vm35_vm0, %v136_v36  ;;  %144 = vperm.xlu0 %273, %v136_v36  }
 0x1bd   :  { %v138_v46 = vmul.f32 1.442695, %v137_v37 }
 0x1c2   :  { %v175_v58 = vld [vmem:[#allocation2] sm:$0xff] }
 0x23a   :  { %v145_v38 = vpop.permute.xlu0 %144 }
 0x23b   :  { %v147_v39 = vsub.f32 %v130_v32, %v145_v38 }
 0x23d   :  { %v148_v40 = vmul.f32 1.442695, %v147_v39 }
 0x23f   :  { %275 = vpow2.f32 %v148_v40 }
 0x240   :  { %277 = vpow2.f32 %v138_v46 }
 0x249   :  { %v276_v44 = vpop.eup %275 }
 0x24a   :  { %150 = vadd.xlane.f32.xlu1 %v276_v44  ;;  %v278_v47 = vpop.eup %277 }
 0x24b   :  { %v141_v49 = vmul.f32 %v278_v47, %v140_v48 }
 0x24e   :  { %168 = vadd.xlane.f32.xlu1 %v167_v45 }
 0x2d7   :  { %v151_v50 = vpop.xlane.xlu1 %150 }
 0x2d8   :  { %v152_v51 = vadd.f32 %v151_v50, %v141_v49 }
 0x2da   :  { %154 = vst.msk [vmem:[#allocation3] sm:$0xff] %vm35_vm0, %v152_v51 }
 0x2db   :  { %v169_v53 = vpop.xlane.xlu1 %168 }
 0x2dc   :  { %v170_v54 = vadd.f32 %v169_v53, %v161_v52 }
 0x2de   :  { %171 = vst.msk [vmem:[#allocation4] sm:$0xff] %vm35_vm0, %v170_v54 }
 0x2e1   :  { %v176_v55 = vld [vmem:[#allocation3] sm:$0xff] }
 0x2e2   :  { %279 = vlog2.f32 %v176_v55 }
 0x2e5   :  { %v180_v60 = vld [vmem:[#allocation4] sm:$0xff] }
 0x2ec   :  { %v280_v56 = vpop.eup %279 }
 0x2ed   :  { %v178_v57 = vmul.f32 0.6931472, %v280_v56 }
 0x2ef   :  { %v179_v59 = vadd.f32 %v178_v57, %v175_v58 }
 0x2f1   :  { %v181_v61 = vsub.f32 %v179_v59, %v180_v60 }
 0x2f3   :  { %182 = vst.msk [vmem:[%s373_s4] sm:$0xff] %vm35_vm0, %v181_v61 }
 0x2f4   :  { %187 = vsyncpa [#allocation6], 1 }

</bundles_post_ra>
